<compile_context>
chip_gen: v6e
topology: v6e:2x2x1
jax: 0.10.0
libtpu: 0.0.40
codegen_flags: <defaults>
</compile_context>

<pallas_src>
import math
import functools

import jax
import jax.numpy as jnp
from jax.experimental import pallas as pl
from jax.experimental.pallas import tpu as pltpu

_LANE = 128


# ----------------------------------------------------------------------------
# Parameter setup (replicates the PyTorch buffer construction exactly,
# including its div_term = 10000^(+2i/C) and sin(position * div_term)).
# ----------------------------------------------------------------------------
def _make_pe(channels: int, max_len: int) -> jnp.ndarray:
    if channels % 2 != 0:
        raise ValueError(
            f"Cannot use sin/cos positional encoding with odd channels "
            f"(got channels={channels})"
        )
    position = jnp.arange(0, max_len, dtype=jnp.float32)[:, None]           # [L, 1]
    div_term = jnp.power(
        10000.0, jnp.arange(0, channels, 2, dtype=jnp.float32) / channels   # [C/2]
    )
    pe = jnp.zeros((max_len, channels), dtype=jnp.float32)
    pe = pe.at[:, 0::2].set(jnp.sin(position * div_term))
    pe = pe.at[:, 1::2].set(jnp.cos(position * div_term))
    return pe.T  # [C, max_len]


# ----------------------------------------------------------------------------
# Kernels: single fused VPU pass, f32 compute, cast on store.
# ----------------------------------------------------------------------------
def _pe_kernel(x_ref, pe_ref, o_ref, *, scale):
    # x_ref/o_ref: (Bb, C, Tt), pe_ref: (C, Tt)
    x = x_ref[...].astype(jnp.float32)
    pe = pe_ref[...].astype(jnp.float32)
    o_ref[...] = (x * scale + pe[None]).astype(o_ref.dtype)


def _pe_kernel_masked(x_ref, pe_ref, mask_ref, o_ref, *, scale):
    # x_ref/o_ref: (Bb, C, Tt), pe_ref: (C, Tt), mask_ref: (Bb, 1, Tt) native dtype
    x = x_ref[...].astype(jnp.float32)
    pe = pe_ref[...].astype(jnp.float32)
    m = mask_ref[...].astype(jnp.float32)      # in-kernel cast: free (VALU slack)
    o_ref[...] = (x * scale + pe[None] * m).astype(o_ref.dtype)


# ----------------------------------------------------------------------------
# Tiling: lane-dense T tiles, multi-batch blocks, padding-aware VMEM budget.
# ----------------------------------------------------------------------------
def _round_up(x: int, m: int) -> int:
    return ((x + m - 1) // m) * m


def _sublane_pad(rows: int, itemsize: int) -> int:
    # sub-32-bit dtypes pack along sublanes: 8 rows (4B), 16 (2B), 32 (1B)
    return _round_up(max(rows, 1), max(8, 32 // max(itemsize, 1)))


def _vmem_limit_bytes() -> int:
    cap = 64 * 1024 * 1024
    try:
        info = pltpu.get_tpu_info()
        cap = int(getattr(info, "vmem_capacity_bytes", cap))
    except Exception:
        pass
    # 64 MiB scoped on 128-MiB-VMEM chips (v5e/v6e), 32 MiB on v7x.
    return min(cap // 2, 64 * 1024 * 1024)


def _block_footprint(bb, C, tt, x_isz, pe_isz, mask_isz):
    tt_pad = _round_up(tt, _LANE)
    xb = bb * _sublane_pad(C, x_isz) * tt_pad * x_isz          # one x block == one out block
    pb = _sublane_pad(C, pe_isz) * tt_pad * pe_isz
    mb = bb * _sublane_pad(1, mask_isz) * tt_pad * mask_isz if mask_isz else 0
    return 2 * (2 * xb + pb + mb)                              # everything double-buffered


def _choose_tiles(B, C, T, x_isz, pe_isz, mask_isz, cap_bytes):
    tt_pad_full = _round_up(T, _LANE)
    xrow = _sublane_pad(C, x_isz) * tt_pad_full * x_isz
    perow = _sublane_pad(C, pe_isz) * tt_pad_full * pe_isz
    mrow = _sublane_pad(1, mask_isz) * tt_pad_full * mask_isz if mask_isz else 0

    if _block_footprint(1, C, T, x_isz, pe_isz, mask_isz) <= cap_bytes:
        # Full-T blocks; grow Bb under budget (ragged last batch block is fine).
        bb = (cap_bytes - 2 * perow) // max(1, 4 * xrow + 2 * mrow)
        return int(max(1, min(B, bb))), T

    # One batch row at a time; lane-dense T tiles (multiples of 128).
    per_grp = _LANE * (4 * _sublane_pad(C, x_isz) * x_isz
                       + 2 * _sublane_pad(C, pe_isz) * pe_isz
                       + (2 * _sublane_pad(1, mask_isz) * mask_isz if mask_isz else 0))
    n_grp = max(1, cap_bytes // max(1, per_grp))
    tt = int(min(n_grp * _LANE, tt_pad_full))
    # Prefer an exact divisor only if it is at most one lane-step smaller;
    # otherwise keep the ragged edge (cheaper than shrinking every block).
    for cand in (tt, tt - _LANE):
        if cand >= _LANE and T % cand == 0:
            return 1, cand
    return 1, tt


# ----------------------------------------------------------------------------
# Forward wrapper.
# ----------------------------------------------------------------------------
def positional_encoding(x, pe, mask=None, first_idx=None, last_idx=None,
                        *, block_budget_bytes=None):
    """x: [B, C, T] (f32 or bf16); pe: [C, max_len] (f32 or bf16); mask: [B, 1, T]."""
    B, C, T = x.shape
    scale = float(math.sqrt(C))

    if first_idx is None:
        if pe.shape[1] < T:
            raise RuntimeError(
                f"Sequence is {T} but PositionalEncoding is limited to {pe.shape[1]}."
            )
        pe_slice = pe if pe.shape[1] == T else pe[:, :T]
        use_mask = mask is not None
    else:
        if last_idx is None:
            raise ValueError("last_idx must be provided together with first_idx.")
        if isinstance(first_idx, int) and isinstance(last_idx, int):
            if not (0 <= first_idx <= last_idx <= pe.shape[1]):
                raise ValueError(
                    f"[first_idx, last_idx)=[{first_idx}, {last_idx}) out of range "
                    f"for pe with max_len={pe.shape[1]}."
                )
            if last_idx - first_idx != T:
                raise ValueError(
                    f"last_idx - first_idx = {last_idx - first_idx} must equal T = {T}."
                )
            pe_slice = pe[:, first_idx:last_idx]
        else:
            # TODO(synk): traced offsets still go through dynamic_slice (extra C*T
            # HBM copy); a scalar-prefetch first_idx + manual pe-window DMA would
            # avoid it on the streaming-decode path.
            pe_slice = jax.lax.dynamic_slice_in_dim(pe, first_idx, T, axis=1)
        use_mask = False  # matches PyTorch: mask is ignored on the first_idx path

    # pe stays in whatever dtype the caller provides (f32 or bf16); upcast in-kernel.
    if use_mask:
        mask_in = mask
        if mask_in.dtype == jnp.bool_:
            mask_in = mask_in.astype(jnp.int8)   # keep the stream narrow
        mask_isz = jnp.dtype(mask_in.dtype).itemsize
    else:
        mask_in = None
        mask_isz = 0

    vmem_limit = _vmem_limit_bytes()
    cap = int(vmem_limit * 0.8)
    if block_budget_bytes is not None:           # test / tuning hook only
        cap = min(cap, int(block_budget_bytes))
    Bb, Tt = _choose_tiles(B, C, T,
                           jnp.dtype(x.dtype).itemsize,
                           jnp.dtype(pe_slice.dtype).itemsize,
                           mask_isz, cap)

    # Batch axis INNERMOST: pe's block index is constant across consecutive
    # steps, so Pallas skips the re-DMA of the pe tile.
    grid = (pl.cdiv(T, Tt), pl.cdiv(B, Bb))

    x_spec = pl.BlockSpec((Bb, C, Tt), lambda ti, bi: (bi, 0, ti))
    pe_spec = pl.BlockSpec((C, Tt), lambda ti, bi: (0, ti))
    out_spec = pl.BlockSpec((Bb, C, Tt), lambda ti, bi: (bi, 0, ti))
    out_shape = jax.ShapeDtypeStruct((B, C, T), x.dtype)

    cparams = pltpu.CompilerParams(
        dimension_semantics=("parallel", "parallel"),   # megacore sharding on v7x
        vmem_limit_bytes=vmem_limit,
    )

    if use_mask:
        mask_spec = pl.BlockSpec((Bb, 1, Tt), lambda ti, bi: (bi, 0, ti))
        return pl.pallas_call(
            functools.partial(_pe_kernel_masked, scale=scale),
            out_shape=out_shape,
            grid_spec=pltpu.PrefetchScalarGridSpec(
                num_scalar_prefetch=0,
                grid=grid,
                in_specs=[x_spec, pe_spec, mask_spec],
                out_specs=out_spec,
            ),
            compiler_params=cparams,
        )(x, pe_slice, mask_in)
    return pl.pallas_call(
        functools.partial(_pe_kernel, scale=scale),
        out_shape=out_shape,
        grid_spec=pltpu.PrefetchScalarGridSpec(
            num_scalar_prefetch=0,
            grid=grid,
            in_specs=[x_spec, pe_spec],
            out_specs=out_spec,
        ),
        compiler_params=cparams,
    )(x, pe_slice)
    # TODO(synk): dropout_p > 0 path not implemented (module defaults to 0.0).


# ----------------------------------------------------------------------------
# Pure-JAX reference.
# ----------------------------------------------------------------------------
def _reference(x, pe, mask=None, first_idx=None, last_idx=None):
    B, C, T = x.shape
    xs = x.astype(jnp.float32) * math.sqrt(C)
    if first_idx is None:
        pos = pe.astype(jnp.float32)[None, :, :T]
        if mask is not None:
            pos = pos * mask.astype(jnp.float32)
    else:
        pos = pe.astype(jnp.float32)[None, :, first_idx:last_idx]
    return (xs + pos).astype(x.dtype)


if __name__ == "__main__":
    B, C, T, MAX_LEN = 2, 4, 16, 64
    key = jax.random.PRNGKey(0)
    kx, km, kx2, kx3 = jax.random.split(key, 4)
    x = jax.random.normal(kx, (B, C, T), dtype=jnp.float32)
    mask = (jax.random.uniform(km, (B, 1, T)) > 0.3).astype(jnp.float32)
    pe = _make_pe(C, MAX_LEN)

    # masked path
    out_masked = jax.block_until_ready(positional_encoding(x, pe, mask=mask))
    assert jnp.allclose(out_masked, _reference(x, pe, mask=mask), atol=1e-5, rtol=1e-5)

    # unmasked path
    out_plain = jax.block_until_ready(positional_encoding(x, pe))
    assert jnp.allclose(out_plain, _reference(x, pe), atol=1e-5, rtol=1e-5)

    # first_idx / last_idx path (mask ignored, matching the PyTorch module)
    x8 = x[:, :, :8]
    out_idx = jax.block_until_ready(positional_encoding(x8, pe, first_idx=4, last_idx=12))
    assert jnp.allclose(out_idx, _reference(x8, pe, first_idx=4, last_idx=12),
                        atol=1e-5, rtol=1e-5)

    # shape exercising full-T blocks with Bb = B (grid (1, 1))
    B2, C2, T2, MAX2 = 3, 8, 2560, 4096
    x2 = jax.random.normal(kx2, (B2, C2, T2), dtype=jnp.float32)
    pe2 = _make_pe(C2, MAX2)
    out2 = jax.block_until_ready(positional_encoding(x2, pe2))
    assert jnp.allclose(out2, _reference(x2, pe2), atol=1e-5, rtol=1e-5)

    # tiny artificial block budget -> exercises T tiling + ragged T edge
    B3, C3, T3, MAX3 = 2, 8, 640, 1024
    x3 = jax.random.normal(kx3, (B3, C3, T3), dtype=jnp.float32)
    pe3 = _make_pe(C3, MAX3)
    out3 = jax.block_until_ready(
        positional_encoding(x3, pe3, block_budget_bytes=96 * 1024))
    assert jnp.allclose(out3, _reference(x3, pe3), atol=1e-5, rtol=1e-5)

    # tiny budget with B=3 -> exercises ragged batch blocks (Bb=2, cdiv grid)
    x3b = jax.random.normal(kx3, (3, C3, T3), dtype=jnp.float32)
    out3b = jax.block_until_ready(
        positional_encoding(x3b, pe3, block_budget_bytes=240 * 1024))
    assert jnp.allclose(out3b, _reference(x3b, pe3), atol=1e-5, rtol=1e-5)

    # bf16 I/O path: pe passed resident in bf16, f32 compute, bf16 store
    xb = x.astype(jnp.bfloat16)
    peb = pe.astype(jnp.bfloat16)
    outb = jax.block_until_ready(positional_encoding(xb, peb, mask=mask))
    refb = _reference(xb, pe, mask=mask)
    assert outb.dtype == jnp.bfloat16
    assert jnp.allclose(outb.astype(jnp.float32), refb.astype(jnp.float32),
                        atol=5e-2, rtol=5e-2)

    print("KERNEL_OK")
</pallas_src>

<mosaic_0001>
module attributes {stable_mosaic.version = 11 : i64} {
  func.func @_pe_kernel_masked(%arg0: i32, %arg1: i32, %arg2: memref<2x4x16xf32, #tpu.memory_space<vmem>>, %arg3: memref<4x16xf32, #tpu.memory_space<vmem>>, %arg4: memref<2x1x16xf32, #tpu.memory_space<vmem>>, %arg5: memref<2x4x16xf32, #tpu.memory_space<vmem>>) attributes {dimension_semantics = [#tpu.dimension_semantics<parallel>, #tpu.dimension_semantics<parallel>], iteration_bounds = array<i64: 1, 1>, scalar_prefetch = 0 : i64, scratch_operands = 0 : i64, tpu.core_type = #tpu.core_type<tc>, window_params = [{transform_indices = @transform_0, window_bounds = array<i64: 2, 4, 16>}, {transform_indices = @transform_1, window_bounds = array<i64: 4, 16>}, {transform_indices = @transform_2, window_bounds = array<i64: 2, 1, 16>}, {transform_indices = @transform_3, window_bounds = array<i64: 2, 4, 16>}]} {
    %c0 = arith.constant 0 : index
    %c0_0 = arith.constant 0 : index
    %c0_1 = arith.constant 0 : index
    %0 = vector.load %arg2[%c0, %c0_0, %c0_1] : memref<2x4x16xf32, #tpu.memory_space<vmem>>, vector<2x4x16xf32>
    %c0_2 = arith.constant 0 : index
    %c0_3 = arith.constant 0 : index
    %1 = vector.load %arg3[%c0_2, %c0_3] : memref<4x16xf32, #tpu.memory_space<vmem>>, vector<4x16xf32>
    %c0_4 = arith.constant 0 : index
    %c0_5 = arith.constant 0 : index
    %c0_6 = arith.constant 0 : index
    %2 = vector.load %arg4[%c0_4, %c0_5, %c0_6] : memref<2x1x16xf32, #tpu.memory_space<vmem>>, vector<2x1x16xf32>
    %cst = arith.constant 2.000000e+00 : f32
    %3 = vector.broadcast %cst : f32 to vector<2x4x16xf32>
    %4 = arith.mulf %0, %3 : vector<2x4x16xf32>
    %5 = vector.shape_cast %1 : vector<4x16xf32> to vector<1x4x16xf32>
    %6 = vector.broadcast %5 : vector<1x4x16xf32> to vector<2x4x16xf32>
    %7 = vector.broadcast %2 : vector<2x1x16xf32> to vector<2x4x16xf32>
    %8 = arith.mulf %6, %7 : vector<2x4x16xf32>
    %9 = arith.addf %4, %8 : vector<2x4x16xf32>
    %c0_7 = arith.constant 0 : index
    %c0_8 = arith.constant 0 : index
    %c0_9 = arith.constant 0 : index
    %10 = vector.load %arg5[%c0_7, %c0_8, %c0_9] : memref<2x4x16xf32, #tpu.memory_space<vmem>>, vector<2x4x16xf32>
    tpu.vector_store %arg5[%c0_7, %c0_8, %c0_9], %9 {strides = array<i32>} : memref<2x4x16xf32, #tpu.memory_space<vmem>>, vector<2x4x16xf32>,
    return
  }
  func.func @transform_0(%arg0: i32, %arg1: i32) -> (i32, i32, i32) {
    %c0_i32 = arith.constant 0 : i32
    %c0_i32_0 = arith.constant 0 : i32
    return %arg1, %c0_i32, %arg0 : i32, i32, i32
  }
  func.func @transform_1(%arg0: i32, %arg1: i32) -> (i32, i32) {
    %c0_i32 = arith.constant 0 : i32
    %c0_i32_0 = arith.constant 0 : i32
    return %c0_i32, %arg0 : i32, i32
  }
  func.func @transform_2(%arg0: i32, %arg1: i32) -> (i32, i32, i32) {
    %c0_i32 = arith.constant 0 : i32
    %c0_i32_0 = arith.constant 0 : i32
    return %arg1, %c0_i32, %arg0 : i32, i32, i32
  }
  func.func @transform_3(%arg0: i32, %arg1: i32) -> (i32, i32, i32) {
    %c0_i32 = arith.constant 0 : i32
    %c0_i32_0 = arith.constant 0 : i32
    return %arg1, %c0_i32, %arg0 : i32, i32, i32
  }
}

</mosaic_0001>

<bundles_post_ra>
// kernel: tpu_custom_call.1
= control target key start
LH: loop header
LB: loop body
LE: loop exit
PB: predicated region body
PF: predicated region fallthrough
CT: control target
= control target key end

     0   :  { %8 = vsyncpa [#allocation3], 0  ;;  %s204_s0 = inlined_call_operand.hbm [shape: f32[2,4,16], index: 0, kind: input, shape index: {}]   ;;  %s205_s1 = inlined_call_operand.hbm [shape: f32[4,16], index: 1, kind: input, shape index: {}]   ;;  %s206_s2 = inlined_call_operand.vmem [shape: f32[2,1,16], index: 2, kind: input, shape index: {}]   ;;  %s207_s3 = inlined_call_operand.hbm [shape: f32[2,4,16], index: 3, kind: output, shape index: {}]  }
   0x1   :  { %9 = vsyncpa [#allocation6], 0 }
   0x2   :  { %10 = vsyncpa [#allocation4], 0  ;;  %s158_s12 = smov [#allocation2]  }
   0x3   :  { %s16_s13 = sshll.u32 %s158_s12, 4  ;;  %s17_s13 = int_to_ptr.vmem [resolvable:$true] %s16_s13 }
   0x4   :  { %s100_s14 = scalar_lea.vmem %s17_s13, 128  ;;  %p105_p1 = scmp.lt.s32.totalorder %s17_s13, %s17_s13 }
   0x5   :  { %p101_p0 = scmp.ne.s32.totalorder %s17_s13, %s100_s14  ;;  %p106_p2 = scmp.lt.s32.totalorder %s100_s14, %s100_s14 }
   0x7   :  { %p107_p3 = por %p106_p2, %p105_p1 }
   0x9   :  { %p108_p4 = pnand %p107_p3, %p101_p0 }
   0xb   :  { %111 = shalt.err (!%p108_p4)
}
   0xc   :  { %s159_s15 = smov 64   ;;  %s160_s16 = smov 4  }
   0xd   :  { %22 = dma.hbm_to_vmem [thread:$0]  %s204_s0, 128, %s17_s13, [#allocation3], %s159_s15, %s159_s15, %s160_s16  }
   0xe   :  { %s161_s19 = smov [#allocation5]  }
   0xf   :  { %s29_s20 = sshll.u32 %s161_s19, 4  ;;  %s30_s20 = int_to_ptr.vmem [resolvable:$true] %s29_s20 }
  0x10   :  { %s120_s21 = scalar_lea.vmem %s30_s20, 64  ;;  %p125_p6 = scmp.lt.s32.totalorder %s30_s20, %s30_s20 }
  0x11   :  { %p121_p5 = scmp.ne.s32.totalorder %s30_s20, %s120_s21  ;;  %p126_p7 = scmp.lt.s32.totalorder %s120_s21, %s120_s21 }
  0x13   :  { %p127_p8 = por %p126_p7, %p125_p6 }
  0x15   :  { %p128_p9 = pnand %p127_p8, %p121_p5 }
  0x17   :  { %131 = shalt.err (!%p128_p9)
}
  0x18   :  { %32 = dma.hbm_to_vmem [thread:$0]  %s205_s1, 64, %s30_s20, [#allocation6]  }
  0x19   :  { %152 = dma.done.wait [#allocation3], 128  }
  0x1a   :  { %153 = vsyncadd [#allocation3], 4294967168 }
  0x1b   :  { %154 = dma.done.wait [#allocation6], 64  }
  0x1c   :  { %155 = vsyncadd [#allocation6], 4294967232  ;;  %v41_v0 = vld [vmem:[#allocation2] sm:$0xf]  ;;  %v43_v1 = vld [vmem:[#allocation5] sm:$0xf] }
  0x1d   :  { %v85_v2 = vld [vmem:[%s206_s2] ss:$0 sm:$0xff]  ;;  %v46_v3 = vmul.f32 2.0, %v41_v0  ;;  %v42_v5 = vld [vmem:[#allocation2 + $0x4] sm:$0xf]  ;;  %s162_s27 = smov [#allocation7]  }
  0x1e   :  { %v60_v4 = vmul.f32 %v85_v2, %v43_v1  ;;  %v86_v6 = vld [vmem:[%s206_s2 + $0x1] ss:$0 sm:$0xff]  ;;  %s72_s28 = sshll.u32 %s162_s27, 4  ;;  %vm64_vm0 = vcmask 125952   ;;  %v47_v7 = vmul.f32 2.0, %v42_v5  ;;  %s73_s28 = int_to_ptr.vmem [resolvable:$true] %s72_s28 }
  0x1f   :  { %v61_v8 = vmul.f32 %v86_v6, %v43_v1  ;;  %s132_s1 = scalar_lea.vmem %s73_s28, 128  ;;  %p137_p11 = scmp.lt.s32.totalorder %s73_s28, %s73_s28 }
  0x20   :  { %v62_v9 = vadd.f32 %v60_v4, %v46_v3  ;;  %p133_p10 = scmp.ne.s32.totalorder %s73_s28, %s132_s1  ;;  %p138_p12 = scmp.lt.s32.totalorder %s132_s1, %s132_s1 }
  0x21   :  { %v63_v10 = vadd.f32 %v61_v8, %v47_v7 }
  0x22   :  { %65 = vst.msk [vmem:[#allocation7] sm:$0xf] %vm64_vm0, %v62_v9  ;;  %p139_p13 = por %p138_p12, %p137_p11 }
  0x23   :  { %66 = vst.msk [vmem:[#allocation7 + $0x4] sm:$0xf] %vm64_vm0, %v63_v10 }
  0x24   :  { %p140_p0 = pnand %p139_p13, %p133_p10 }
  0x26   :  { %143 = shalt.err (!%p140_p0)
}
  0x27   :  { %78 = dma.vmem_to_hbm [thread:$0]  %s73_s28, 128, %s207_s3, [#allocation4], %s159_s15, %s159_s15, %s160_s16  }
  0x28   :  { %156 = dma.done.wait [#allocation4], 128  }
  0x29   :  { %157 = vsyncadd [#allocation4], 4294967168 }
  0x2a   :  { %82 = vsyncpa [#allocation3], 1 }
  0x2b   :  { %83 = vsyncpa [#allocation6], 1 }
  0x2c   :  { %84 = vsyncpa [#allocation4], 1 }

</bundles_post_ra>
